<compile_context>
chip_gen: v7x
topology: tpu7x:2x2x1
jax: 0.10.0
libtpu: 0.0.40
codegen_flags: <defaults>
</compile_context>

<pallas_src>
import functools

import jax
import jax.numpy as jnp
from jax.experimental import pallas as pl
from jax.experimental.pallas import tpu as pltpu


def _round_up(x: int, m: int) -> int:
    return (x + m - 1) // m * m


def _tpu_vmem_and_gen():
    """Best-effort query of per-core VMEM capacity + generation hints."""
    kind = ""
    try:
        kind = jax.devices()[0].device_kind.lower()
    except Exception:
        pass
    vmem_cap = None
    try:  # generation-aware cap (perf-review item); safe fallback if missing
        info = pltpu.get_tpu_info()
        vmem_cap = int(getattr(info, "vmem_capacity_bytes", 0)) or None
    except Exception:
        vmem_cap = None
    if vmem_cap is None:
        vmem_cap = (64 << 20) if "7" in kind else (128 << 20)  # v7x: 64 MiB/TC
    is_v5 = "v5" in kind
    return vmem_cap, is_v5


# ---------------------------------------------------------------------------
# Kernel. Grid = (batch_tiles, out_col_tiles). The output-column axis j is the
# innermost grid axis, so the hidden activations for a batch tile are computed
# once at j == 0, cached in VMEM scratch, and reused for every W2 column tile.
# ---------------------------------------------------------------------------
def mlp_kernel(x_ref, w1_ref, b1_ref, w2_ref, b2_ref, out_ref, h_ref):
    @pl.when(pl.program_id(1) == 0)
    def _():
        # hidden = ReLU(x @ W1 + b1): MXU matmul, f32 accumulation, f32 bias.
        h = jnp.dot(x_ref[...], w1_ref[...], preferred_element_type=jnp.float32)
        h = jnp.maximum(h + b1_ref[...], 0.0)
        h_ref[...] = h.astype(h_ref.dtype)

    # out = hidden @ W2_tile + b2_tile  -- lane-dense, unmasked store.
    o = jnp.dot(h_ref[...], w2_ref[...], preferred_element_type=jnp.float32)
    out_ref[...] = (o + b2_ref[...]).astype(out_ref.dtype)


def prepare_params(w1, b1, w2, b2, *, compute_dtype=jnp.float32):
    """Pad / cast the parameters ONCE (hoisted out of the per-call path).

    Zero padding is mathematically neutral: padded hidden units see ReLU(0)=0
    and the corresponding W2 rows are 0; padded output lanes are sliced off.

    Returns (arrays, static): `arrays` is a dict of jnp arrays for net_forward,
    `static` is a dict of Python ints to bind via functools.partial.
    """
    n_input, n_hidden = w1.shape
    n_output = w2.shape[1]
    cdt = jnp.dtype(compute_dtype)
    H = _round_up(n_hidden, 128)    # hidden width (contraction of matmul #2)
    NO = _round_up(n_output, 128)   # lane-dense output width

    w1p = jnp.zeros((n_input, H), cdt).at[:, :n_hidden].set(w1.astype(cdt))
    b1p = jnp.zeros((1, H), jnp.float32).at[:, :n_hidden].set(
        jnp.reshape(b1, (1, n_hidden)).astype(jnp.float32))
    w2p = jnp.zeros((H, NO), cdt).at[:n_hidden, :n_output].set(w2.astype(cdt))
    b2p = jnp.zeros((1, NO), jnp.float32).at[:, :n_output].set(
        jnp.reshape(b2, (1, n_output)).astype(jnp.float32))

    arrays = dict(w1=w1p, b1=b1p, w2=w2p, b2=b2p)
    static = dict(n_output=n_output)
    return arrays, static


def net_forward(x, w1, b1, w2, b2, *, n_output, block_batch=None):
    """Forward pass of Net.

    x: (batch, n_input). w1/b1/w2/b2 are the *padded* parameters produced by
    `prepare_params` (compute dtype weights, f32 biases). Returns the
    (batch, n_output) output in x.dtype.
    """
    batch, n_input = x.shape
    K, H = w1.shape
    NO = w2.shape[1]
    assert K == n_input and w2.shape[0] == H
    cdt = w1.dtype
    out_dtype = x.dtype
    itemsize = jnp.dtype(cdt).itemsize
    out_itemsize = jnp.dtype(out_dtype).itemsize

    vmem_cap, is_v5 = _tpu_vmem_and_gen()
    small_vmem = vmem_cap <= (64 << 20)            # v7x-class

    # ---- batch tile (TB) ---------------------------------------------------
    # Round to the dtype's sublane packing (8 f32 / 16 bf16 / 32 8-bit) so x
    # loads and out stores stay unmasked and vreg-dense.
    sub = 8 * max(1, 4 // itemsize)
    if block_batch is not None:
        TB = _round_up(max(sub, min(block_batch, max(batch, sub))), sub)
    elif batch <= 128:
        TB = _round_up(batch, sub)
    elif batch >= 512 and (not is_v5) and (not small_vmem) and H <= 2048:
        # v6e: 256-row tiles fill the 256x256 MXU.  v5e keeps 128 (4x128^2
        # MXU, single vst slot); large H keeps 128 to bound the live f32
        # hidden (vreg pressure).
        TB = 256
    else:
        TB = 128
    B = _round_up(batch, TB)
    nB = B // TB          # batch > 128 => nB >= 2, so the "parallel" batch
                          # axis can shard across v7x's two TensorCores.

    # ---- output-column tile (TN) --------------------------------------------
    # Keep W2/b2/out fully resident when they fit comfortably; tile the output
    # columns (v7x / very wide layers) once a resident W2 would hog VMEM.
    w2_budget = (8 << 20) if small_vmem else (32 << 20)
    TN = NO
    for cand in (512, 256, 128):
        if H * TN * itemsize <= w2_budget:
            break
        if NO % cand == 0:
            TN = cand
    nJ = NO // TN

    # ---- per-operand buffering ------------------------------------------------
    w1_bytes = K * H * itemsize + H * 4
    w2_bytes = H * TN * itemsize + TN * 4
    resident_bytes = w1_bytes + (w2_bytes if nJ == 1 else 0)
    # Single-buffer the constant-index (resident) weights only when their
    # footprint is big enough to matter (saves half the resident VMEM on v7x).
    single_buf = resident_bytes > ((4 << 20) if small_vmem else (16 << 20))

    def _spec(shape, imap, constant):
        if constant and single_buf:
            return pl.BlockSpec(shape, imap, pipeline_mode=pl.Buffered(1))
        return pl.BlockSpec(shape, imap)

    in_specs = [
        # x: tiled over batch, FULL-K block (no 128-padding of a tiny n_input;
        # a block dim equal to the full array dim is exempt from the 128 rule).
        pl.BlockSpec((TB, n_input), lambda i, j: (i, 0)),
        _spec((n_input, H), lambda i, j: (0, 0), True),        # W1: resident
        _spec((1, H), lambda i, j: (0, 0), True),              # b1: resident
        _spec((H, TN), lambda i, j: (0, j), nJ == 1),          # W2: tiled over NO
        _spec((1, TN), lambda i, j: (0, j), nJ == 1),          # b2
    ]
    out_spec = pl.BlockSpec((TB, TN), lambda i, j: (i, j))     # lane-dense store

    # ---- only remaining per-call prep: cast x + pad batch rows (cheap) -------
    x_in = x.astype(cdt) if x.dtype != cdt else x
    if B != batch:
        x_in = jnp.zeros((B, n_input), cdt).at[:batch].set(x_in)

    # ---- VMEM budget + generation-aware limit ---------------------------------
    nbw = 1 if single_buf else 2
    vmem_need = (
        2 * TB * n_input * itemsize                  # x (double-buffered)
        + 2 * TB * TN * out_itemsize                 # out (double-buffered)
        + nbw * w1_bytes                             # W1 + b1
        + (nbw if nJ == 1 else 2) * w2_bytes         # W2 + b2
        + TB * H * itemsize                          # cached hidden scratch
        + TB * max(H, TN) * 4                        # in-flight f32 intermediates
    )
    vmem_limit = int(min(max(2 * vmem_need, 8 << 20), vmem_cap * 3 // 4))

    # Advisory cost estimate for XLA scheduling around the custom call.
    flops = 2 * B * (n_input * H + H * NO)
    bytes_accessed = (
        B * n_input * itemsize + (n_input * H + H * NO) * itemsize
        + (H + NO) * 4 + B * NO * out_itemsize
    )
    cost = pl.CostEstimate(flops=int(flops), transcendentals=0,
                           bytes_accessed=int(bytes_accessed))

    out_padded = pl.pallas_call(
        mlp_kernel,
        out_shape=jax.ShapeDtypeStruct((B, NO), out_dtype),
        grid_spec=pltpu.PrefetchScalarGridSpec(
            num_scalar_prefetch=0,
            grid=(nB, nJ),
            in_specs=in_specs,
            out_specs=out_spec,
            scratch_shapes=[pltpu.VMEM((TB, H), cdt)],   # cached hidden tile
        ),
        compiler_params=pltpu.CompilerParams(
            # Batch axis shards across TensorCores (v7x megacore); the output-
            # column axis is "arbitrary" because the hidden scratch is carried
            # across j within a batch tile.
            dimension_semantics=("parallel", "arbitrary"),
            vmem_limit_bytes=vmem_limit,
        ),
        cost_estimate=cost,
    )(x_in, w1, b1, w2, b2)

    return out_padded[:batch, :n_output]


def net_reference(x, w1, b1, w2, b2):
    """Plain-JAX reference (also the right choice for tiny problem sizes)."""
    h = jnp.maximum(jnp.dot(x, w1, precision="highest") + b1, 0.0)
    return jnp.dot(h, w2, precision="highest") + b2


def init_params(key, n_input, n_hidden, n_output, dtype=jnp.float32):
    # Deterministic init mirroring torch.nn.Linear's U(-1/sqrt(fan_in), ...).
    k1, k2, k3, k4 = jax.random.split(key, 4)
    lim1 = 1.0 / jnp.sqrt(jnp.float32(n_input))
    lim2 = 1.0 / jnp.sqrt(jnp.float32(n_hidden))
    w1 = jax.random.uniform(k1, (n_input, n_hidden), dtype, -lim1, lim1)
    b1 = jax.random.uniform(k2, (1, n_hidden), dtype, -lim1, lim1)
    w2 = jax.random.uniform(k3, (n_hidden, n_output), dtype, -lim2, lim2)
    b2 = jax.random.uniform(k4, (1, n_output), dtype, -lim2, lim2)
    return w1, b1, w2, b2


if __name__ == "__main__":
    n_input, n_hidden, n_output = 4, 32, 2
    batch = 8

    key = jax.random.PRNGKey(0)
    kx, kp = jax.random.split(key)
    x = jax.random.normal(kx, (batch, n_input), jnp.float32)
    w1, b1, w2, b2 = init_params(kp, n_input, n_hidden, n_output)

    ref = net_reference(x, w1, b1, w2, b2)

    # f32 path: tight check. Params are padded/cast ONCE, outside the jit call.
    arrays_f32, static = prepare_params(w1, b1, w2, b2, compute_dtype=jnp.float32)
    fwd_f32 = jax.jit(functools.partial(net_forward, **static))
    out = fwd_f32(x, **arrays_f32)
    jax.block_until_ready(out)
    assert out.shape == (batch, n_output)
    assert jnp.allclose(out, ref, atol=1e-4, rtol=1e-4)

    # bf16-operand path (f32 accumulation) for v6e/v7x bandwidth / MXU peak.
    arrays_bf16, static_bf16 = prepare_params(w1, b1, w2, b2,
                                              compute_dtype=jnp.bfloat16)
    fwd_bf16 = jax.jit(functools.partial(net_forward, **static_bf16))
    out_bf16 = fwd_bf16(x, **arrays_bf16)
    jax.block_until_ready(out_bf16)
    assert out_bf16.shape == (batch, n_output)
    assert jnp.allclose(out_bf16.astype(jnp.float32), ref, atol=1e-1, rtol=1e-1)

    # TODO(synk): optional fp8 weight path for v7x inference (f32 accumulation)
    # is not wired up; bf16 is the lowest precision exercised here.
    print("KERNEL_OK")
</pallas_src>

<mosaic_0001>
module attributes {stable_mosaic.version = 11 : i64} {
  func.func @mlp_kernel(%arg0: i32, %arg1: i32, %arg2: memref<8x4xf32, #tpu.memory_space<vmem>>, %arg3: memref<4x128xf32, #tpu.memory_space<vmem>>, %arg4: memref<1x128xf32, #tpu.memory_space<vmem>>, %arg5: memref<128x128xf32, #tpu.memory_space<vmem>>, %arg6: memref<1x128xf32, #tpu.memory_space<vmem>>, %arg7: memref<8x128xf32, #tpu.memory_space<vmem>>, %arg8: memref<8x128xf32, #tpu.memory_space<vmem>>) attributes {dimension_semantics = [#tpu.dimension_semantics<parallel>, #tpu.dimension_semantics<arbitrary>], iteration_bounds = array<i64: 1, 1>, scalar_prefetch = 0 : i64, scratch_operands = 1 : i64, tpu.core_type = #tpu.core_type<tc>, window_params = [{transform_indices = @transform_0, window_bounds = array<i64: 8, 4>}, {pipeline_mode = #tpu.pipeline_mode<synchronous>, transform_indices = @transform_1, window_bounds = array<i64: 4, 128>}, {pipeline_mode = #tpu.pipeline_mode<synchronous>, transform_indices = @transform_2, window_bounds = array<i64: 1, 128>}, {transform_indices = @transform_3, window_bounds = array<i64: 128, 128>}, {transform_indices = @transform_4, window_bounds = array<i64: 1, 128>}, {transform_indices = @transform_5, window_bounds = array<i64: 8, 128>}]} {
    %c0_i32 = arith.constant 0 : i32
    %0 = arith.cmpi eq, %arg1, %c0_i32 : i32
    %1 = arith.extui %0 : i1 to i32
    %c0_i32_0 = arith.constant 0 : i32
    %2 = arith.cmpi ne, %1, %c0_i32_0 : i32
    scf.if %2 {
      %c0_8 = arith.constant 0 : index
      %c0_9 = arith.constant 0 : index
      %10 = vector.load %arg2[%c0_8, %c0_9] : memref<8x4xf32, #tpu.memory_space<vmem>>, vector<8x4xf32>
      %c0_10 = arith.constant 0 : index
      %c0_11 = arith.constant 0 : index
      %11 = vector.load %arg3[%c0_10, %c0_11] : memref<4x128xf32, #tpu.memory_space<vmem>>, vector<4x128xf32>
      %cst_12 = arith.constant dense<0.000000e+00> : vector<8x128xf32>
      %12 = tpu.matmul %10, %11, %cst_12 {dimension_numbers = #tpu.dot_dimension_numbers<[1], [0], [0], [1], [0, 0, 1, 1], [], []>} : vector<8x4xf32>, vector<4x128xf32>, vector<8x128xf32> -> vector<8x128xf32>
      %c0_13 = arith.constant 0 : index
      %c0_14 = arith.constant 0 : index
      %13 = vector.load %arg4[%c0_13, %c0_14] : memref<1x128xf32, #tpu.memory_space<vmem>>, vector<1x128xf32>
      %14 = vector.broadcast %13 : vector<1x128xf32> to vector<8x128xf32>
      %15 = arith.addf %12, %14 : vector<8x128xf32>
      %cst_15 = arith.constant 0.000000e+00 : f32
      %16 = vector.broadcast %cst_15 : f32 to vector<8x128xf32>
      %17 = arith.maximumf %15, %16 : vector<8x128xf32>
      %c0_16 = arith.constant 0 : index
      %c0_17 = arith.constant 0 : index
      %18 = vector.load %arg8[%c0_16, %c0_17] : memref<8x128xf32, #tpu.memory_space<vmem>>, vector<8x128xf32>
      tpu.vector_store %arg8[%c0_16, %c0_17], %17 {strides = array<i32>} : memref<8x128xf32, #tpu.memory_space<vmem>>, vector<8x128xf32>,
    } else {
    }
    %c0 = arith.constant 0 : index
    %c0_1 = arith.constant 0 : index
    %3 = vector.load %arg8[%c0, %c0_1] : memref<8x128xf32, #tpu.memory_space<vmem>>, vector<8x128xf32>
    %c0_2 = arith.constant 0 : index
    %c0_3 = arith.constant 0 : index
    %4 = vector.load %arg5[%c0_2, %c0_3] : memref<128x128xf32, #tpu.memory_space<vmem>>, vector<128x128xf32>
    %cst = arith.constant dense<0.000000e+00> : vector<8x128xf32>
    %5 = tpu.matmul %3, %4, %cst {dimension_numbers = #tpu.dot_dimension_numbers<[1], [0], [0], [1], [0, 0, 1, 1], [], []>} : vector<8x128xf32>, vector<128x128xf32>, vector<8x128xf32> -> vector<8x128xf32>
    %c0_4 = arith.constant 0 : index
    %c0_5 = arith.constant 0 : index
    %6 = vector.load %arg6[%c0_4, %c0_5] : memref<1x128xf32, #tpu.memory_space<vmem>>, vector<1x128xf32>
    %7 = vector.broadcast %6 : vector<1x128xf32> to vector<8x128xf32>
    %8 = arith.addf %5, %7 : vector<8x128xf32>
    %c0_6 = arith.constant 0 : index
    %c0_7 = arith.constant 0 : index
    %9 = vector.load %arg7[%c0_6, %c0_7] : memref<8x128xf32, #tpu.memory_space<vmem>>, vector<8x128xf32>
    tpu.vector_store %arg7[%c0_6, %c0_7], %8 {strides = array<i32>} : memref<8x128xf32, #tpu.memory_space<vmem>>, vector<8x128xf32>,
    return
  }
  func.func @transform_0(%arg0: i32, %arg1: i32) -> (i32, i32) {
    %c0_i32 = arith.constant 0 : i32
    %c0_i32_0 = arith.constant 0 : i32
    return %arg0, %c0_i32 : i32, i32
  }
  func.func @transform_1(%arg0: i32, %arg1: i32) -> (i32, i32) {
    %c0_i32 = arith.constant 0 : i32
    %c0_i32_0 = arith.constant 0 : i32
    %c0_i32_1 = arith.constant 0 : i32
    return %c0_i32, %c0_i32_0 : i32, i32
  }
  func.func @transform_2(%arg0: i32, %arg1: i32) -> (i32, i32) {
    %c0_i32 = arith.constant 0 : i32
    %c0_i32_0 = arith.constant 0 : i32
    %c0_i32_1 = arith.constant 0 : i32
    return %c0_i32, %c0_i32_0 : i32, i32
  }
  func.func @transform_3(%arg0: i32, %arg1: i32) -> (i32, i32) {
    %c0_i32 = arith.constant 0 : i32
    %c0_i32_0 = arith.constant 0 : i32
    return %c0_i32, %arg1 : i32, i32
  }
  func.func @transform_4(%arg0: i32, %arg1: i32) -> (i32, i32) {
    %c0_i32 = arith.constant 0 : i32
    %c0_i32_0 = arith.constant 0 : i32
    return %c0_i32, %arg1 : i32, i32
  }
  func.func @transform_5(%arg0: i32, %arg1: i32) -> (i32, i32) {
    %c0_i32 = arith.constant 0 : i32
    return %arg0, %arg1 : i32, i32
  }
}

</mosaic_0001>

<bundles_post_ra>
// kernel: net_forward.1
= control target key start
LH: loop header
LB: loop body
LE: loop exit
PB: predicated region body
PF: predicated region fallthrough
CT: control target
= control target key end

     0   :  { %10 = vsyncpa [#allocation4], 0  ;;  %s344_s18 = smov [#allocation3]   ;;  %s407_s0 = inlined_call_operand.vmem [shape: f32[8,4], index: 0, kind: input, shape index: {}]   ;;  %s408_s1 = inlined_call_operand.vmem [shape: f32[4,128], index: 1, kind: input, shape index: {}]   ;;  %s409_s2 = inlined_call_operand.vmem [shape: f32[1,128], index: 2, kind: input, shape index: {}]   ;;  %s410_s3 = inlined_call_operand.hbm [shape: f32[128,128], index: 3, kind: input, shape index: {}]   ;;  %s411_s4 = inlined_call_operand.vmem [shape: f32[1,128], index: 4, kind: input, shape index: {}]   ;;  %s412_s5 = inlined_call_operand.vmem [shape: f32[8,128], index: 5, kind: output, shape index: {}]  }
   0x1   :  { %s22_s19 = sshll.u32 %s344_s18, 4  ;;  %s320_s22 = scalar_lea.hbm %s410_s3, 2048  ;;  %s23_s19 = int_to_ptr.vmem [resolvable:$true] %s22_s19 }
   0x2   :  { %p321_p0 = scmp.ne.s32.totalorder %s410_s3, %s320_s22  ;;  %p324_p1 = scmp.lt.u32.totalorder %s320_s22, %s410_s3 }
   0x4   :  { %p326_p2 = pnand %p324_p1, %p321_p0 }
   0x6   :  { %329 = shalt.err (!%p326_p2)
}
   0x7   :  { %s330_s27 = scalar_lea.vmem %s23_s19, 2048  ;;  %p335_p4 = scmp.lt.s32.totalorder %s23_s19, %s23_s19 }
   0x8   :  { %p331_p3 = scmp.ne.s32.totalorder %s23_s19, %s330_s27  ;;  %p336_p5 = scmp.lt.s32.totalorder %s330_s27, %s330_s27 }
   0xa   :  { %p337_p6 = por %p336_p5, %p335_p4 }
   0xc   :  { %p338_p7 = pnand %p337_p6, %p331_p3 }
   0xe   :  { %341 = shalt.err (!%p338_p7)
}
   0xf   :  { %s345_s28 = smov 128   ;;  %s346_s29 = smov 8  }
  0x10   :  { %28 = dma.hbm_to_vmem [thread:$0]  %s410_s3, 2048, %s23_s19, [#allocation4], %s345_s28, %s345_s28, %s346_s29  }
  0x11   :  { %342 = dma.done.wait [#allocation4], 2048  }
  0x12   :  { %343 = vsyncadd [#allocation4], 4294965248  ;;  %v347_v0 = vmov 0.0   ;;  %vm348_vm0 = vmmov 0   ;;  %v349_v1 = vmov 0.0|0.0   ;;  %vm51_vm1 = vcmask 1043456  }
  0x13   :  { %250 = vmatprep.subr.mxu0 %v347_v0  ;;  %252 = vmatprep.mubr.msk.f32.mxu0 %vm348_vm0, %v347_v0  ;;  %vm47_vm2 = vcmask 31744   ;;  %v39_v2 = vld [vmem:[%s408_s1] sm:$0xf]  ;;  %v129_v5 = vld [vmem:[#allocation3 + $0x8] sm:$0xff]  ;;  %v130_v6 = vld [vmem:[#allocation3 + $0x10] sm:$0xff] }
  0x14   :  { %290 = vmatprep.subr.bf16.mxu1 %v349_v1  ;;  %287 = vmatprep.mubr.msk.f32.mxu1 %vm348_vm0, %v347_v0  ;;  %v38_v3 = vld [vmem:[%s407_s0] sm:$0xff]  ;;  %v131_v7 = vld [vmem:[#allocation3 + $0x18] sm:$0xff]  ;;  %v133_v11 = vld [vmem:[#allocation3 + $0x28] sm:$0xff] }
  0x15   :  { %v128_v4 = vld [vmem:[#allocation3] sm:$0xff]  ;;  %251 = vmatpush3.msk.msra.mxu0 %vm51_vm1, %v39_v2  ;;  %v294_v9 = vpack.c.bf16 %v131_v7, %v130_v6  ;;  %v134_v13 = vld [vmem:[#allocation3 + $0x30] sm:$0xff]  ;;  %v135_v14 = vld [vmem:[#allocation3 + $0x38] sm:$0xff] }
  0x16   :  { %253 = vmatmul.mubr.msk.f32.vlgmr.msra.gmra.mrb[0].mxu0 %vm47_vm2, %v38_v3  ;;  %v291_v8 = vpack.c.bf16 %v129_v5, %v128_v4  ;;  %v132_v10 = vld [vmem:[#allocation3 + $0x20] sm:$0xff]  ;;  %v300_v15 = vpack.c.bf16 %v135_v14, %v134_v13  ;;  %v137_v17 = vld [vmem:[#allocation3 + $0x48] sm:$0xff]  ;;  %v138_v19 = vld [vmem:[#allocation3 + $0x50] sm:$0xff] }
  0x17   :  { %v297_v12 = vpack.c.bf16 %v133_v11, %v132_v10  ;;  %v136_v16 = vld [vmem:[#allocation3 + $0x40] sm:$0xff]  ;;  %v139_v20 = vld [vmem:[#allocation3 + $0x58] sm:$0xff]  ;;  %v141_v23 = vld [vmem:[#allocation3 + $0x68] sm:$0xff] }
  0x18   :  { %292 = vmatpush3.bf16.msra.mxu1 %v291_v8  ;;  %v303_v18 = vpack.c.bf16 %v137_v17, %v136_v16  ;;  %v306_v21 = vpack.c.bf16 %v139_v20, %v138_v19  ;;  %v140_v22 = vld [vmem:[#allocation3 + $0x60] sm:$0xff]  ;;  %v142_v25 = vld [vmem:[#allocation3 + $0x70] sm:$0xff]  ;;  %v143_v26 = vld [vmem:[#allocation3 + $0x78] sm:$0xff] }
  0x19   :  { %293 = vmatprep.subr.bf16.mxu1 %v349_v1  ;;  %v309_v24 = vpack.c.bf16 %v141_v23, %v140_v22  ;;  %v312_v27 = vpack.c.bf16 %v143_v26, %v142_v25  ;;  %v227_v28 = vld [vmem:[%s409_s2] ss:$0 sm:$0xff] }
  0x1a   :  { %v230_v33 = vld [vmem:[%s411_s4] ss:$0 sm:$0xff] }
  0x1c   :  { %295 = vmatpush3.bf16.msra.mxu1 %v294_v9 }
  0x1d   :  { %296 = vmatprep.subr.bf16.mxu1 %v349_v1 }
  0x20   :  { %298 = vmatpush3.bf16.msra.mxu1 %v297_v12 }
  0x21   :  { %299 = vmatprep.subr.bf16.mxu1 %v349_v1 }
  0x24   :  { %301 = vmatpush3.bf16.msra.mxu1 %v300_v15 }
  0x25   :  { %302 = vmatprep.subr.bf16.mxu1 %v349_v1 }
  0x28   :  { %304 = vmatpush3.bf16.msra.mxu1 %v303_v18 }
  0x29   :  { %305 = vmatprep.subr.bf16.mxu1 %v349_v1 }
  0x2c   :  { %307 = vmatpush3.bf16.msra.mxu1 %v306_v21 }
  0x2d   :  { %308 = vmatprep.subr.bf16.mxu1 %v349_v1 }
  0x30   :  { %310 = vmatpush3.bf16.msra.mxu1 %v309_v24 }
  0x31   :  { %311 = vmatprep.subr.bf16.mxu1 %v349_v1 }
  0x34   :  { %313 = vmatpush3.bf16.msra.mxu1 %v312_v27 }
  0xe9   :  { %v121_v29 = vpop.f32.mrb[0].mxu0 }
  0xea   :  { %v122_v30 = vadd.f32 %v227_v28, %v121_v29  ;;  %v254_v31 = vpop.f32.mrb[1].mxu0 }
  0xec   :  { %v125_v32 = vmax.f32 %v122_v30, 0.0 }
  0xee   :  { %288 = vmatmul.mubr.f32.vlgmr.msra.gmra.mrb[0].mxu1 %v125_v32 }
 0x1c1   :  { %v217_v34 = vpop.f32.mrb[0].mxu1 }
 0x1c2   :  { %v218_v35 = vadd.f32 %v230_v33, %v217_v34  ;;  %v289_v36 = vpop.f32.mrb[1].mxu1 }
 0x1c4   :  { %221 = vst [vmem:[%s412_s5] sm:$0xff] %v218_v35 }
 0x1c5   :  { %226 = vsyncpa [#allocation4], 1 }

</bundles_post_ra>
